<compile_context>
chip_gen: v7x
topology: tpu7x:2x2x1
jax: 0.10.0
libtpu: 0.0.40
codegen_flags: <defaults>
</compile_context>

<pallas_src>
import functools
import math

import jax
import jax.numpy as jnp
from jax.experimental import pallas as pl
from jax.experimental.pallas import tpu as pltpu


def _mha_kernel(key_ref, query_ref, value_ref, wk_bd_ref, w_big_ref, b_wide_ref,
                out_ref, *, S, H, D, Q):
    """One batch per grid step; everything stays in VMEM / vregs.

    key_ref/query_ref/value_ref : (S, E)       E = H*D on lanes
    wk_bd_ref                   : (E, E)       kron(I_H, Wk.T)
    w_big_ref                   : (H*E, H*E)   concat reinterpretation folded into Wo.T
    b_wide_ref                  : (1, H*E)     tile(b_out, H)
    out_ref                     : (Q, H*E)     lane-dense packed output slab:
                                               out[h*Q + q, :] == out_ref[q, h*E:(h+1)*E]
    """
    E = H * D
    inv_sqrt_d = 1.0 / math.sqrt(D)

    # (1) One fat MXU matmul projects k, q and v with Wk (the reference applies
    #     key_matrix to all three).  Contraction K = E, not D.
    x = jnp.concatenate([key_ref[...], query_ref[...], value_ref[...]], axis=0)  # (3S, E)
    proj = jnp.dot(x, wk_bd_ref[...], preferred_element_type=jnp.float32)        # (3S, E)
    k2 = proj[0:S]            # (S, E)  [s, h*D + d]
    q2 = proj[S:2 * S]
    v2 = proj[2 * S:3 * S]

    # (2) Per-position (H x H) head-mixing scores + softmax + context, computed as
    #     2-D lane-block ops (no 4-D broadcast intermediates, no in-kernel reshape).
    qh = [q2[:, i * D:(i + 1) * D] for i in range(H)]
    kh = [k2[:, j * D:(j + 1) * D] for j in range(H)]
    vh = [v2[:, j * D:(j + 1) * D] for j in range(H)]
    ctx_blocks = []
    for i in range(H):
        prods = [jnp.sum(qh[i] * kh[j], axis=-1, keepdims=True) * inv_sqrt_d
                 for j in range(H)]                                    # H x (S, 1)
        m = functools.reduce(jnp.maximum, prods)
        exps = [jnp.exp(p - m) for p in prods]
        inv_denom = 1.0 / functools.reduce(jnp.add, exps)              # exact divide
        ctx_i = (exps[0] * inv_denom) * vh[0]
        for j in range(1, H):
            ctx_i = ctx_i + (exps[j] * inv_denom) * vh[j]
        ctx_blocks.append(ctx_i)                                       # (S, D)
    ctx = jnp.concatenate(ctx_blocks, axis=1)                          # (S, E) [s, h*D+d]

    # (3) The reference's raw `concat` reinterpretation, packed lane-dense:
    #       cpack[q, s2*E + c] = ctx[q*H + s2, c]
    #     realized with static single-row slices + concats (at large S this becomes a
    #     strided VMEM-scratch slice:  ctx_ref[pl.ds(s2, Q, stride=H), :]).
    cpack = jnp.concatenate(
        [jnp.concatenate(
            [ctx[q * H + s2:q * H + s2 + 1, :] for s2 in range(H)], axis=1)
         for q in range(Q)],
        axis=0)                                                        # (Q, H*E)

    # (4) Single fused output projection (concat permutation folded into w_big) with a
    #     lane-dense (Q, H*E) store.
    out_ref[...] = (
        jnp.dot(cpack, w_big_ref[...], preferred_element_type=jnp.float32)
        + b_wide_ref[...]
    ).astype(out_ref.dtype)


def multi_head_attention(key, query, value, w_key, w_out, b_out, *, n_heads):
    B, S, E = key.shape
    Sq = query.shape[1]
    if Sq != S:
        # The reference's batched matmul q @ k.transpose(-1, 2) requires equal seq lens.
        raise ValueError("reference semantics require seq_len_query == seq_len")
    H = n_heads
    D = E // H
    if H * D != E:
        raise ValueError("embed_dim must be divisible by n_heads")
    if S % H != 0:
        # TODO(synk): packed concat layout assumes seq_len % n_heads == 0.
        raise ValueError("this kernel requires seq_len % n_heads == 0")
    Q = S // H
    HE = H * E

    # Host-side weight preprocessing (tiny, O(E^2) / O((H*E)^2), independent of B and S).
    wk_bd = jnp.kron(jnp.eye(H, dtype=w_key.dtype), w_key.T)              # (E, E)
    # w_big folds the concat reinterpretation and Wo together:
    #   w_big[s2*E + h*D + d, h*E + e] = Wo.T[s2*D + d, e]
    wo_t4 = w_out.T.reshape(H, D, E)                                      # [s2, d, e]
    w_big = jnp.einsum("sde,hk->shdke", wo_t4,
                       jnp.eye(H, dtype=w_out.dtype)).reshape(HE, HE)     # (H*E, H*E)
    b_wide = jnp.tile(b_out.reshape(1, E), (1, H))                        # (1, H*E)

    kernel = functools.partial(_mha_kernel, S=S, H=H, D=D, Q=Q)

    flops = 2 * B * (3 * S * E * E          # fused Wk projection
                     + S * H * H * 2 * D    # scores + context
                     + Q * HE * HE)         # fused output projection
    cost = pl.CostEstimate(
        flops=flops,
        transcendentals=B * S * H * H,
        bytes_accessed=4 * (4 * B * S * E + E * E + HE * HE + HE))

    out_packed = pl.pallas_call(
        kernel,
        out_shape=jax.ShapeDtypeStruct((B, Q, HE), jnp.float32),
        grid_spec=pltpu.PrefetchScalarGridSpec(
            num_scalar_prefetch=0,
            grid=(B,),
            in_specs=[
                pl.BlockSpec((None, S, E), lambda b: (b, 0, 0)),   # key
                pl.BlockSpec((None, S, E), lambda b: (b, 0, 0)),   # query
                pl.BlockSpec((None, S, E), lambda b: (b, 0, 0)),   # value
                pl.BlockSpec((E, E), lambda b: (0, 0)),            # kron(I_H, Wk.T)
                pl.BlockSpec((HE, HE), lambda b: (0, 0)),          # folded Wo
                pl.BlockSpec((1, HE), lambda b: (0, 0)),           # tiled bias
            ],
            out_specs=pl.BlockSpec((None, Q, HE), lambda b: (b, 0, 0)),
        ),
        compiler_params=pltpu.CompilerParams(
            dimension_semantics=("parallel",),
            vmem_limit_bytes=32 * 1024 * 1024),
        cost_estimate=cost,
    )(key, query, value, wk_bd, w_big, b_wide)

    # Free wrapper layout plumbing: out[b, h*Q + q, :] == out_packed[b, q, h*E:(h+1)*E].
    out = out_packed.reshape(B, Q, H, E).transpose(0, 2, 1, 3).reshape(B, S, E)
    return out


def mha_reference(key, query, value, w_key, w_out, b_out, n_heads):
    """Plain-JAX mirror of the (buggy-as-written) PyTorch forward."""
    B, S, E = key.shape
    Sq = query.shape[1]
    H = n_heads
    D = E // H
    k = key.reshape(B, S, H, D) @ w_key.T
    q = query.reshape(B, Sq, H, D) @ w_key.T
    v = value.reshape(B, S, H, D) @ w_key.T
    k_adj = jnp.swapaxes(k, -1, 2)                      # (B, S, D, H)
    product = jnp.matmul(q, k_adj) / math.sqrt(D)       # (B, S, H, H)
    scores = jax.nn.softmax(product, axis=-1)
    scores = jnp.matmul(scores, v)                      # (B, S, H, D)
    concat = jnp.transpose(scores, (0, 2, 1, 3)).reshape(B, Sq, H * D)
    return concat @ w_out.T + b_out


if __name__ == "__main__":
    embed_dim, n_heads = 32, 4
    B, S = 2, 8
    D = embed_dim // n_heads

    root = jax.random.PRNGKey(0)
    kin_k, kin_q, kin_v, kwq, kwk, kwv, kwo, kbo = jax.random.split(root, 8)

    key_in = jax.random.normal(kin_k, (B, S, embed_dim), jnp.float32)
    query_in = jax.random.normal(kin_q, (B, S, embed_dim), jnp.float32)
    value_in = jax.random.normal(kin_v, (B, S, embed_dim), jnp.float32)

    # Deterministic synthetic parameters (shapes from __init__).  query_matrix /
    # value_matrix exist in the module but are unused by its forward(); created only
    # for shape fidelity.
    w_query = jax.random.normal(kwq, (D, D), jnp.float32) * 0.2   # unused in forward
    w_key = jax.random.normal(kwk, (D, D), jnp.float32) * 0.2
    w_value = jax.random.normal(kwv, (D, D), jnp.float32) * 0.2   # unused in forward
    w_out = jax.random.normal(kwo, (embed_dim, embed_dim), jnp.float32) * 0.1
    b_out = jax.random.normal(kbo, (embed_dim,), jnp.float32) * 0.1

    out = multi_head_attention(
        key_in, query_in, value_in, w_key, w_out, b_out, n_heads=n_heads
    )
    out = jax.block_until_ready(out)

    ref = mha_reference(key_in, query_in, value_in, w_key, w_out, b_out, n_heads)
    assert out.shape == (B, S, embed_dim), out.shape
    assert jnp.allclose(out, ref, atol=1e-4, rtol=1e-4), float(
        jnp.max(jnp.abs(out - ref))
    )
    print("KERNEL_OK")
</pallas_src>

<mosaic_0001>
module attributes {stable_mosaic.version = 11 : i64} {
  func.func @_mha_kernel(%arg0: i32, %arg1: memref<1x8x32xf32, #tpu.memory_space<vmem>>, %arg2: memref<1x8x32xf32, #tpu.memory_space<vmem>>, %arg3: memref<1x8x32xf32, #tpu.memory_space<vmem>>, %arg4: memref<32x32xf32, #tpu.memory_space<vmem>>, %arg5: memref<128x128xf32, #tpu.memory_space<vmem>>, %arg6: memref<1x128xf32, #tpu.memory_space<vmem>>, %arg7: memref<1x2x128xf32, #tpu.memory_space<vmem>>) attributes {dimension_semantics = [#tpu.dimension_semantics<parallel>], iteration_bounds = array<i64: 2>, scalar_prefetch = 0 : i64, scratch_operands = 0 : i64, tpu.core_type = #tpu.core_type<tc>, window_params = [{transform_indices = @transform_0, window_bounds = array<i64: 1, 8, 32>}, {transform_indices = @transform_1, window_bounds = array<i64: 1, 8, 32>}, {transform_indices = @transform_2, window_bounds = array<i64: 1, 8, 32>}, {pipeline_mode = #tpu.pipeline_mode<synchronous>, transform_indices = @transform_3, window_bounds = array<i64: 32, 32>}, {pipeline_mode = #tpu.pipeline_mode<synchronous>, transform_indices = @transform_4, window_bounds = array<i64: 128, 128>}, {pipeline_mode = #tpu.pipeline_mode<synchronous>, transform_indices = @transform_5, window_bounds = array<i64: 1, 128>}, {transform_indices = @transform_6, window_bounds = array<i64: 1, 2, 128>}]} {
    %c0 = arith.constant 0 : index
    %c0_0 = arith.constant 0 : index
    %c0_1 = arith.constant 0 : index
    %0 = vector.load %arg1[%c0, %c0_0, %c0_1] : memref<1x8x32xf32, #tpu.memory_space<vmem>>, vector<1x8x32xf32>
    %1 = vector.shape_cast %0 : vector<1x8x32xf32> to vector<8x32xf32>
    %c0_2 = arith.constant 0 : index
    %c0_3 = arith.constant 0 : index
    %c0_4 = arith.constant 0 : index
    %2 = vector.load %arg2[%c0_2, %c0_3, %c0_4] : memref<1x8x32xf32, #tpu.memory_space<vmem>>, vector<1x8x32xf32>
    %3 = vector.shape_cast %2 : vector<1x8x32xf32> to vector<8x32xf32>
    %c0_5 = arith.constant 0 : index
    %c0_6 = arith.constant 0 : index
    %c0_7 = arith.constant 0 : index
    %4 = vector.load %arg3[%c0_5, %c0_6, %c0_7] : memref<1x8x32xf32, #tpu.memory_space<vmem>>, vector<1x8x32xf32>
    %5 = vector.shape_cast %4 : vector<1x8x32xf32> to vector<8x32xf32>
    %6 = tpu.concatenate %1, %3, %5 in 0 : vector<8x32xf32>, vector<8x32xf32>, vector<8x32xf32> -> vector<24x32xf32>
    %c0_8 = arith.constant 0 : index
    %c0_9 = arith.constant 0 : index
    %7 = vector.load %arg4[%c0_8, %c0_9] : memref<32x32xf32, #tpu.memory_space<vmem>>, vector<32x32xf32>
    %cst = arith.constant dense<0.000000e+00> : vector<24x32xf32>
    %8 = tpu.matmul %6, %7, %cst {dimension_numbers = #tpu.dot_dimension_numbers<[1], [0], [0], [1], [0, 0, 1, 1], [], []>} : vector<24x32xf32>, vector<32x32xf32>, vector<24x32xf32> -> vector<24x32xf32>
    %9 = vector.extract_strided_slice %8 {offsets = [0, 0], sizes = [8, 32], strides = [1, 1]} : vector<24x32xf32> to vector<8x32xf32>
    %10 = vector.extract_strided_slice %8 {offsets = [8, 0], sizes = [8, 32], strides = [1, 1]} : vector<24x32xf32> to vector<8x32xf32>
    %11 = vector.extract_strided_slice %8 {offsets = [16, 0], sizes = [8, 32], strides = [1, 1]} : vector<24x32xf32> to vector<8x32xf32>
    %12 = vector.extract_strided_slice %10 {offsets = [0, 0], sizes = [8, 8], strides = [1, 1]} : vector<8x32xf32> to vector<8x8xf32>
    %13 = vector.extract_strided_slice %10 {offsets = [0, 8], sizes = [8, 8], strides = [1, 1]} : vector<8x32xf32> to vector<8x8xf32>
    %14 = vector.extract_strided_slice %10 {offsets = [0, 16], sizes = [8, 8], strides = [1, 1]} : vector<8x32xf32> to vector<8x8xf32>
    %15 = vector.extract_strided_slice %10 {offsets = [0, 24], sizes = [8, 8], strides = [1, 1]} : vector<8x32xf32> to vector<8x8xf32>
    %16 = vector.extract_strided_slice %9 {offsets = [0, 0], sizes = [8, 8], strides = [1, 1]} : vector<8x32xf32> to vector<8x8xf32>
    %17 = vector.extract_strided_slice %9 {offsets = [0, 8], sizes = [8, 8], strides = [1, 1]} : vector<8x32xf32> to vector<8x8xf32>
    %18 = vector.extract_strided_slice %9 {offsets = [0, 16], sizes = [8, 8], strides = [1, 1]} : vector<8x32xf32> to vector<8x8xf32>
    %19 = vector.extract_strided_slice %9 {offsets = [0, 24], sizes = [8, 8], strides = [1, 1]} : vector<8x32xf32> to vector<8x8xf32>
    %20 = vector.extract_strided_slice %11 {offsets = [0, 0], sizes = [8, 8], strides = [1, 1]} : vector<8x32xf32> to vector<8x8xf32>
    %21 = vector.extract_strided_slice %11 {offsets = [0, 8], sizes = [8, 8], strides = [1, 1]} : vector<8x32xf32> to vector<8x8xf32>
    %22 = vector.extract_strided_slice %11 {offsets = [0, 16], sizes = [8, 8], strides = [1, 1]} : vector<8x32xf32> to vector<8x8xf32>
    %23 = vector.extract_strided_slice %11 {offsets = [0, 24], sizes = [8, 8], strides = [1, 1]} : vector<8x32xf32> to vector<8x8xf32>
    %24 = arith.mulf %12, %16 : vector<8x8xf32>
    %cst_10 = arith.constant dense<0.000000e+00> : vector<8xf32>
    %25 = vector.multi_reduction <add>, %24, %cst_10 [1] : vector<8x8xf32> to vector<8xf32>
    %26 = vector.shape_cast %25 : vector<8xf32> to vector<8x1xf32>
    %cst_11 = arith.constant 0.353553385 : f32
    %27 = vector.broadcast %cst_11 : f32 to vector<8x1xf32>
    %28 = arith.mulf %26, %27 : vector<8x1xf32>
    %29 = arith.mulf %12, %17 : vector<8x8xf32>
    %cst_12 = arith.constant dense<0.000000e+00> : vector<8xf32>
    %30 = vector.multi_reduction <add>, %29, %cst_12 [1] : vector<8x8xf32> to vector<8xf32>
    %31 = vector.shape_cast %30 : vector<8xf32> to vector<8x1xf32>
    %cst_13 = arith.constant 0.353553385 : f32
    %32 = vector.broadcast %cst_13 : f32 to vector<8x1xf32>
    %33 = arith.mulf %31, %32 : vector<8x1xf32>
    %34 = arith.mulf %12, %18 : vector<8x8xf32>
    %cst_14 = arith.constant dense<0.000000e+00> : vector<8xf32>
    %35 = vector.multi_reduction <add>, %34, %cst_14 [1] : vector<8x8xf32> to vector<8xf32>
    %36 = vector.shape_cast %35 : vector<8xf32> to vector<8x1xf32>
    %cst_15 = arith.constant 0.353553385 : f32
    %37 = vector.broadcast %cst_15 : f32 to vector<8x1xf32>
    %38 = arith.mulf %36, %37 : vector<8x1xf32>
    %39 = arith.mulf %12, %19 : vector<8x8xf32>
    %cst_16 = arith.constant dense<0.000000e+00> : vector<8xf32>
    %40 = vector.multi_reduction <add>, %39, %cst_16 [1] : vector<8x8xf32> to vector<8xf32>
    %41 = vector.shape_cast %40 : vector<8xf32> to vector<8x1xf32>
    %cst_17 = arith.constant 0.353553385 : f32
    %42 = vector.broadcast %cst_17 : f32 to vector<8x1xf32>
    %43 = arith.mulf %41, %42 : vector<8x1xf32>
    %44 = arith.maximumf %28, %33 : vector<8x1xf32>
    %45 = arith.maximumf %44, %38 : vector<8x1xf32>
    %46 = arith.maximumf %45, %43 : vector<8x1xf32>
    %47 = arith.subf %28, %46 : vector<8x1xf32>
    %48 = math.exp %47 : vector<8x1xf32>
    %49 = arith.subf %33, %46 : vector<8x1xf32>
    %50 = math.exp %49 : vector<8x1xf32>
    %51 = arith.subf %38, %46 : vector<8x1xf32>
    %52 = math.exp %51 : vector<8x1xf32>
    %53 = arith.subf %43, %46 : vector<8x1xf32>
    %54 = math.exp %53 : vector<8x1xf32>
    %55 = arith.addf %48, %50 : vector<8x1xf32>
    %56 = arith.addf %55, %52 : vector<8x1xf32>
    %57 = arith.addf %56, %54 : vector<8x1xf32>
    %cst_18 = arith.constant 1.000000e+00 : f32
    %58 = vector.broadcast %cst_18 : f32 to vector<8x1xf32>
    %59 = arith.divf %58, %57 : vector<8x1xf32>
    %60 = arith.mulf %48, %59 : vector<8x1xf32>
    %61 = vector.broadcast %60 : vector<8x1xf32> to vector<8x8xf32>
    %62 = arith.mulf %61, %20 : vector<8x8xf32>
    %63 = arith.mulf %50, %59 : vector<8x1xf32>
    %64 = vector.broadcast %63 : vector<8x1xf32> to vector<8x8xf32>
    %65 = arith.mulf %64, %21 : vector<8x8xf32>
    %66 = arith.addf %62, %65 : vector<8x8xf32>
    %67 = arith.mulf %52, %59 : vector<8x1xf32>
    %68 = vector.broadcast %67 : vector<8x1xf32> to vector<8x8xf32>
    %69 = arith.mulf %68, %22 : vector<8x8xf32>
    %70 = arith.addf %66, %69 : vector<8x8xf32>
    %71 = arith.mulf %54, %59 : vector<8x1xf32>
    %72 = vector.broadcast %71 : vector<8x1xf32> to vector<8x8xf32>
    %73 = arith.mulf %72, %23 : vector<8x8xf32>
    %74 = arith.addf %70, %73 : vector<8x8xf32>
    %75 = arith.mulf %13, %16 : vector<8x8xf32>
    %cst_19 = arith.constant dense<0.000000e+00> : vector<8xf32>
    %76 = vector.multi_reduction <add>, %75, %cst_19 [1] : vector<8x8xf32> to vector<8xf32>
    %77 = vector.shape_cast %76 : vector<8xf32> to vector<8x1xf32>
    %cst_20 = arith.constant 0.353553385 : f32
    %78 = vector.broadcast %cst_20 : f32 to vector<8x1xf32>
    %79 = arith.mulf %77, %78 : vector<8x1xf32>
    %80 = arith.mulf %13, %17 : vector<8x8xf32>
    %cst_21 = arith.constant dense<0.000000e+00> : vector<8xf32>
    %81 = vector.multi_reduction <add>, %80, %cst_21 [1] : vector<8x8xf32> to vector<8xf32>
    %82 = vector.shape_cast %81 : vector<8xf32> to vector<8x1xf32>
    %cst_22 = arith.constant 0.353553385 : f32
    %83 = vector.broadcast %cst_22 : f32 to vector<8x1xf32>
    %84 = arith.mulf %82, %83 : vector<8x1xf32>
    %85 = arith.mulf %13, %18 : vector<8x8xf32>
    %cst_23 = arith.constant dense<0.000000e+00> : vector<8xf32>
    %86 = vector.multi_reduction <add>, %85, %cst_23 [1] : vector<8x8xf32> to vector<8xf32>
    %87 = vector.shape_cast %86 : vector<8xf32> to vector<8x1xf32>
    %cst_24 = arith.constant 0.353553385 : f32
    %88 = vector.broadcast %cst_24 : f32 to vector<8x1xf32>
    %89 = arith.mulf %87, %88 : vector<8x1xf32>
    %90 = arith.mulf %13, %19 : vector<8x8xf32>
    %cst_25 = arith.constant dense<0.000000e+00> : vector<8xf32>
    %91 = vector.multi_reduction <add>, %90, %cst_25 [1] : vector<8x8xf32> to vector<8xf32>
    %92 = vector.shape_cast %91 : vector<8xf32> to vector<8x1xf32>
    %cst_26 = arith.constant 0.353553385 : f32
    %93 = vector.broadcast %cst_26 : f32 to vector<8x1xf32>
    %94 = arith.mulf %92, %93 : vector<8x1xf32>
    %95 = arith.maximumf %79, %84 : vector<8x1xf32>
    %96 = arith.maximumf %95, %89 : vector<8x1xf32>
    %97 = arith.maximumf %96, %94 : vector<8x1xf32>
    %98 = arith.subf %79, %97 : vector<8x1xf32>
    %99 = math.exp %98 : vector<8x1xf32>
    %100 = arith.subf %84, %97 : vector<8x1xf32>
    %101 = math.exp %100 : vector<8x1xf32>
    %102 = arith.subf %89, %97 : vector<8x1xf32>
    %103 = math.exp %102 : vector<8x1xf32>
    %104 = arith.subf %94, %97 : vector<8x1xf32>
    %105 = math.exp %104 : vector<8x1xf32>
    %106 = arith.addf %99, %101 : vector<8x1xf32>
    %107 = arith.addf %106, %103 : vector<8x1xf32>
    %108 = arith.addf %107, %105 : vector<8x1xf32>
    %cst_27 = arith.constant 1.000000e+00 : f32
    %109 = vector.broadcast %cst_27 : f32 to vector<8x1xf32>
    %110 = arith.divf %109, %108 : vector<8x1xf32>
    %111 = arith.mulf %99, %110 : vector<8x1xf32>
    %112 = vector.broadcast %111 : vector<8x1xf32> to vector<8x8xf32>
    %113 = arith.mulf %112, %20 : vector<8x8xf32>
    %114 = arith.mulf %101, %110 : vector<8x1xf32>
    %115 = vector.broadcast %114 : vector<8x1xf32> to vector<8x8xf32>
    %116 = arith.mulf %115, %21 : vector<8x8xf32>
    %117 = arith.addf %113, %116 : vector<8x8xf32>
    %118 = arith.mulf %103, %110 : vector<8x1xf32>
    %119 = vector.broadcast %118 : vector<8x1xf32> to vector<8x8xf32>
    %120 = arith.mulf %119, %22 : vector<8x8xf32>
    %121 = arith.addf %117, %120 : vector<8x8xf32>
    %122 = arith.mulf %105, %110 : vector<8x1xf32>
    %123 = vector.broadcast %122 : vector<8x1xf32> to vector<8x8xf32>
    %124 = arith.mulf %123, %23 : vector<8x8xf32>
    %125 = arith.addf %121, %124 : vector<8x8xf32>
    %126 = arith.mulf %14, %16 : vector<8x8xf32>
    %cst_28 = arith.constant dense<0.000000e+00> : vector<8xf32>
    %127 = vector.multi_reduction <add>, %126, %cst_28 [1] : vector<8x8xf32> to vector<8xf32>
    %128 = vector.shape_cast %127 : vector<8xf32> to vector<8x1xf32>
    %cst_29 = arith.constant 0.353553385 : f32
    %129 = vector.broadcast %cst_29 : f32 to vector<8x1xf32>
    %130 = arith.mulf %128, %129 : vector<8x1xf32>
    %131 = arith.mulf %14, %17 : vector<8x8xf32>
    %cst_30 = arith.constant dense<0.000000e+00> : vector<8xf32>
    %132 = vector.multi_reduction <add>, %131, %cst_30 [1] : vector<8x8xf32> to vector<8xf32>
    %133 = vector.shape_cast %132 : vector<8xf32> to vector<8x1xf32>
    %cst_31 = arith.constant 0.353553385 : f32
    %134 = vector.broadcast %cst_31 : f32 to vector<8x1xf32>
    %135 = arith.mulf %133, %134 : vector<8x1xf32>
    %136 = arith.mulf %14, %18 : vector<8x8xf32>
    %cst_32 = arith.constant dense<0.000000e+00> : vector<8xf32>
    %137 = vector.multi_reduction <add>, %136, %cst_32 [1] : vector<8x8xf32> to vector<8xf32>
    %138 = vector.shape_cast %137 : vector<8xf32> to vector<8x1xf32>
    %cst_33 = arith.constant 0.353553385 : f32
    %139 = vector.broadcast %cst_33 : f32 to vector<8x1xf32>
    %140 = arith.mulf %138, %139 : vector<8x1xf32>
    %141 = arith.mulf %14, %19 : vector<8x8xf32>
    %cst_34 = arith.constant dense<0.000000e+00> : vector<8xf32>
    %142 = vector.multi_reduction <add>, %141, %cst_34 [1] : vector<8x8xf32> to vector<8xf32>
    %143 = vector.shape_cast %142 : vector<8xf32> to vector<8x1xf32>
    %cst_35 = arith.constant 0.353553385 : f32
    %144 = vector.broadcast %cst_35 : f32 to vector<8x1xf32>
    %145 = arith.mulf %143, %144 : vector<8x1xf32>
    %146 = arith.maximumf %130, %135 : vector<8x1xf32>
    %147 = arith.maximumf %146, %140 : vector<8x1xf32>
    %148 = arith.maximumf %147, %145 : vector<8x1xf32>
    %149 = arith.subf %130, %148 : vector<8x1xf32>
    %150 = math.exp %149 : vector<8x1xf32>
    %151 = arith.subf %135, %148 : vector<8x1xf32>
    %152 = math.exp %151 : vector<8x1xf32>
    %153 = arith.subf %140, %148 : vector<8x1xf32>
    %154 = math.exp %153 : vector<8x1xf32>
    %155 = arith.subf %145, %148 : vector<8x1xf32>
    %156 = math.exp %155 : vector<8x1xf32>
    %157 = arith.addf %150, %152 : vector<8x1xf32>
    %158 = arith.addf %157, %154 : vector<8x1xf32>
    %159 = arith.addf %158, %156 : vector<8x1xf32>
    %cst_36 = arith.constant 1.000000e+00 : f32
    %160 = vector.broadcast %cst_36 : f32 to vector<8x1xf32>
    %161 = arith.divf %160, %159 : vector<8x1xf32>
    %162 = arith.mulf %150, %161 : vector<8x1xf32>
    %163 = vector.broadcast %162 : vector<8x1xf32> to vector<8x8xf32>
    %164 = arith.mulf %163, %20 : vector<8x8xf32>
    %165 = arith.mulf %152, %161 : vector<8x1xf32>
    %166 = vector.broadcast %165 : vector<8x1xf32> to vector<8x8xf32>
    %167 = arith.mulf %166, %21 : vector<8x8xf32>
    %168 = arith.addf %164, %167 : vector<8x8xf32>
    %169 = arith.mulf %154, %161 : vector<8x1xf32>
    %170 = vector.broadcast %169 : vector<8x1xf32> to vector<8x8xf32>
    %171 = arith.mulf %170, %22 : vector<8x8xf32>
    %172 = arith.addf %168, %171 : vector<8x8xf32>
    %173 = arith.mulf %156, %161 : vector<8x1xf32>
    %174 = vector.broadcast %173 : vector<8x1xf32> to vector<8x8xf32>
    %175 = arith.mulf %174, %23 : vector<8x8xf32>
    %176 = arith.addf %172, %175 : vector<8x8xf32>
    %177 = arith.mulf %15, %16 : vector<8x8xf32>
    %cst_37 = arith.constant dense<0.000000e+00> : vector<8xf32>
    %178 = vector.multi_reduction <add>, %177, %cst_37 [1] : vector<8x8xf32> to vector<8xf32>
    %179 = vector.shape_cast %178 : vector<8xf32> to vector<8x1xf32>
    %cst_38 = arith.constant 0.353553385 : f32
    %180 = vector.broadcast %cst_38 : f32 to vector<8x1xf32>
    %181 = arith.mulf %179, %180 : vector<8x1xf32>
    %182 = arith.mulf %15, %17 : vector<8x8xf32>
    %cst_39 = arith.constant dense<0.000000e+00> : vector<8xf32>
    %183 = vector.multi_reduction <add>, %182, %cst_39 [1] : vector<8x8xf32> to vector<8xf32>
    %184 = vector.shape_cast %183 : vector<8xf32> to vector<8x1xf32>
    %cst_40 = arith.constant 0.353553385 : f32
    %185 = vector.broadcast %cst_40 : f32 to vector<8x1xf32>
    %186 = arith.mulf %184, %185 : vector<8x1xf32>
    %187 = arith.mulf %15, %18 : vector<8x8xf32>
    %cst_41 = arith.constant dense<0.000000e+00> : vector<8xf32>
    %188 = vector.multi_reduction <add>, %187, %cst_41 [1] : vector<8x8xf32> to vector<8xf32>
    %189 = vector.shape_cast %188 : vector<8xf32> to vector<8x1xf32>
    %cst_42 = arith.constant 0.353553385 : f32
    %190 = vector.broadcast %cst_42 : f32 to vector<8x1xf32>
    %191 = arith.mulf %189, %190 : vector<8x1xf32>
    %192 = arith.mulf %15, %19 : vector<8x8xf32>
    %cst_43 = arith.constant dense<0.000000e+00> : vector<8xf32>
    %193 = vector.multi_reduction <add>, %192, %cst_43 [1] : vector<8x8xf32> to vector<8xf32>
    %194 = vector.shape_cast %193 : vector<8xf32> to vector<8x1xf32>
    %cst_44 = arith.constant 0.353553385 : f32
    %195 = vector.broadcast %cst_44 : f32 to vector<8x1xf32>
    %196 = arith.mulf %194, %195 : vector<8x1xf32>
    %197 = arith.maximumf %181, %186 : vector<8x1xf32>
    %198 = arith.maximumf %197, %191 : vector<8x1xf32>
    %199 = arith.maximumf %198, %196 : vector<8x1xf32>
    %200 = arith.subf %181, %199 : vector<8x1xf32>
    %201 = math.exp %200 : vector<8x1xf32>
    %202 = arith.subf %186, %199 : vector<8x1xf32>
    %203 = math.exp %202 : vector<8x1xf32>
    %204 = arith.subf %191, %199 : vector<8x1xf32>
    %205 = math.exp %204 : vector<8x1xf32>
    %206 = arith.subf %196, %199 : vector<8x1xf32>
    %207 = math.exp %206 : vector<8x1xf32>
    %208 = arith.addf %201, %203 : vector<8x1xf32>
    %209 = arith.addf %208, %205 : vector<8x1xf32>
    %210 = arith.addf %209, %207 : vector<8x1xf32>
    %cst_45 = arith.constant 1.000000e+00 : f32
    %211 = vector.broadcast %cst_45 : f32 to vector<8x1xf32>
    %212 = arith.divf %211, %210 : vector<8x1xf32>
    %213 = arith.mulf %201, %212 : vector<8x1xf32>
    %214 = vector.broadcast %213 : vector<8x1xf32> to vector<8x8xf32>
    %215 = arith.mulf %214, %20 : vector<8x8xf32>
    %216 = arith.mulf %203, %212 : vector<8x1xf32>
    %217 = vector.broadcast %216 : vector<8x1xf32> to vector<8x8xf32>
    %218 = arith.mulf %217, %21 : vector<8x8xf32>
    %219 = arith.addf %215, %218 : vector<8x8xf32>
    %220 = arith.mulf %205, %212 : vector<8x1xf32>
    %221 = vector.broadcast %220 : vector<8x1xf32> to vector<8x8xf32>
    %222 = arith.mulf %221, %22 : vector<8x8xf32>
    %223 = arith.addf %219, %222 : vector<8x8xf32>
    %224 = arith.mulf %207, %212 : vector<8x1xf32>
    %225 = vector.broadcast %224 : vector<8x1xf32> to vector<8x8xf32>
    %226 = arith.mulf %225, %23 : vector<8x8xf32>
    %227 = arith.addf %223, %226 : vector<8x8xf32>
    %228 = tpu.concatenate %74, %125, %176, %227 in 1 : vector<8x8xf32>, vector<8x8xf32>, vector<8x8xf32>, vector<8x8xf32> -> vector<8x32xf32>
    %229 = vector.extract_strided_slice %228 {offsets = [0, 0], sizes = [1, 32], strides = [1, 1]} : vector<8x32xf32> to vector<1x32xf32>
    %230 = vector.extract_strided_slice %228 {offsets = [1, 0], sizes = [1, 32], strides = [1, 1]} : vector<8x32xf32> to vector<1x32xf32>
    %231 = vector.extract_strided_slice %228 {offsets = [2, 0], sizes = [1, 32], strides = [1, 1]} : vector<8x32xf32> to vector<1x32xf32>
    %232 = vector.extract_strided_slice %228 {offsets = [3, 0], sizes = [1, 32], strides = [1, 1]} : vector<8x32xf32> to vector<1x32xf32>
    %233 = tpu.concatenate %229, %230, %231, %232 in 1 : vector<1x32xf32>, vector<1x32xf32>, vector<1x32xf32>, vector<1x32xf32> -> vector<1x128xf32>
    %234 = vector.extract_strided_slice %228 {offsets = [4, 0], sizes = [1, 32], strides = [1, 1]} : vector<8x32xf32> to vector<1x32xf32>
    %235 = vector.extract_strided_slice %228 {offsets = [5, 0], sizes = [1, 32], strides = [1, 1]} : vector<8x32xf32> to vector<1x32xf32>
    %236 = vector.extract_strided_slice %228 {offsets = [6, 0], sizes = [1, 32], strides = [1, 1]} : vector<8x32xf32> to vector<1x32xf32>
    %237 = vector.extract_strided_slice %228 {offsets = [7, 0], sizes = [1, 32], strides = [1, 1]} : vector<8x32xf32> to vector<1x32xf32>
    %238 = tpu.concatenate %234, %235, %236, %237 in 1 : vector<1x32xf32>, vector<1x32xf32>, vector<1x32xf32>, vector<1x32xf32> -> vector<1x128xf32>
    %239 = tpu.concatenate %233, %238 in 0 : vector<1x128xf32>, vector<1x128xf32> -> vector<2x128xf32>
    %c0_46 = arith.constant 0 : index
    %c0_47 = arith.constant 0 : index
    %240 = vector.load %arg5[%c0_46, %c0_47] : memref<128x128xf32, #tpu.memory_space<vmem>>, vector<128x128xf32>
    %cst_48 = arith.constant dense<0.000000e+00> : vector<2x128xf32>
    %241 = tpu.matmul %239, %240, %cst_48 {dimension_numbers = #tpu.dot_dimension_numbers<[1], [0], [0], [1], [0, 0, 1, 1], [], []>} : vector<2x128xf32>, vector<128x128xf32>, vector<2x128xf32> -> vector<2x128xf32>
    %c0_49 = arith.constant 0 : index
    %c0_50 = arith.constant 0 : index
    %242 = vector.load %arg6[%c0_49, %c0_50] : memref<1x128xf32, #tpu.memory_space<vmem>>, vector<1x128xf32>
    %243 = vector.broadcast %242 : vector<1x128xf32> to vector<2x128xf32>
    %244 = arith.addf %241, %243 : vector<2x128xf32>
    %c0_51 = arith.constant 0 : index
    %c0_52 = arith.constant 0 : index
    %c0_53 = arith.constant 0 : index
    %245 = vector.load %arg7[%c0_51, %c0_52, %c0_53] : memref<1x2x128xf32, #tpu.memory_space<vmem>>, vector<1x2x128xf32>
    %246 = vector.shape_cast %245 : vector<1x2x128xf32> to vector<2x128xf32>
    %247 = vector.shape_cast %244 : vector<2x128xf32> to vector<1x2x128xf32>
    tpu.vector_store %arg7[%c0_51, %c0_52, %c0_53], %247 {strides = array<i32>} : memref<1x2x128xf32, #tpu.memory_space<vmem>>, vector<1x2x128xf32>,
    return
  }
  func.func @transform_0(%arg0: i32) -> (i32, i32, i32) {
    %c0_i32 = arith.constant 0 : i32
    %c0_i32_0 = arith.constant 0 : i32
    %c0_i32_1 = arith.constant 0 : i32
    return %arg0, %c0_i32, %c0_i32_0 : i32, i32, i32
  }
  func.func @transform_1(%arg0: i32) -> (i32, i32, i32) {
    %c0_i32 = arith.constant 0 : i32
    %c0_i32_0 = arith.constant 0 : i32
    %c0_i32_1 = arith.constant 0 : i32
    return %arg0, %c0_i32, %c0_i32_0 : i32, i32, i32
  }
  func.func @transform_2(%arg0: i32) -> (i32, i32, i32) {
    %c0_i32 = arith.constant 0 : i32
    %c0_i32_0 = arith.constant 0 : i32
    %c0_i32_1 = arith.constant 0 : i32
    return %arg0, %c0_i32, %c0_i32_0 : i32, i32, i32
  }
  func.func @transform_3(%arg0: i32) -> (i32, i32) {
    %c0_i32 = arith.constant 0 : i32
    %c0_i32_0 = arith.constant 0 : i32
    %c0_i32_1 = arith.constant 0 : i32
    return %c0_i32, %c0_i32_0 : i32, i32
  }
  func.func @transform_4(%arg0: i32) -> (i32, i32) {
    %c0_i32 = arith.constant 0 : i32
    %c0_i32_0 = arith.constant 0 : i32
    %c0_i32_1 = arith.constant 0 : i32
    return %c0_i32, %c0_i32_0 : i32, i32
  }
  func.func @transform_5(%arg0: i32) -> (i32, i32) {
    %c0_i32 = arith.constant 0 : i32
    %c0_i32_0 = arith.constant 0 : i32
    %c0_i32_1 = arith.constant 0 : i32
    return %c0_i32, %c0_i32_0 : i32, i32
  }
  func.func @transform_6(%arg0: i32) -> (i32, i32, i32) {
    %c0_i32 = arith.constant 0 : i32
    %c0_i32_0 = arith.constant 0 : i32
    %c0_i32_1 = arith.constant 0 : i32
    return %arg0, %c0_i32, %c0_i32_0 : i32, i32, i32
  }
}

</mosaic_0001>

<bundles_post_ra>
// kernel: tpu_custom_call.1
= control target key start
LH: loop header
LB: loop body
LE: loop exit
PB: predicated region body
PF: predicated region fallthrough
CT: control target
= control target key end

     0   :  { %s2015_s0 = inlined_call_operand.hbm [shape: f32[2,8,32], index: 0, kind: input, shape index: {}]   ;;  %s2016_s1 = inlined_call_operand.hbm [shape: f32[2,8,32], index: 1, kind: input, shape index: {}]   ;;  %s2017_s2 = inlined_call_operand.hbm [shape: f32[2,8,32], index: 2, kind: input, shape index: {}]   ;;  %s2018_s3 = inlined_call_operand.hbm [shape: f32[32,32], index: 3, kind: input, shape index: {}]   ;;  %s2019_s4 = inlined_call_operand.hbm [shape: f32[128,128], index: 4, kind: input, shape index: {}]   ;;  %s2020_s5 = inlined_call_operand.vmem [shape: f32[1,128], index: 5, kind: input, shape index: {}]   ;;  %s2021_s6 = inlined_call_operand.hbm [shape: f32[2,2,128], index: 6, kind: output, shape index: {}]  }
   0x1   :  { %2038 = sst [smem:[#allocation18_spill]] %s2016_s1 }
   0x2   :  { %2039 = sst [smem:[#allocation19_spill]] %s2018_s3 }
   0x3   :  { %11 = vsyncpa [#allocation3], 0 }
   0x4   :  { %13 = vsyncpa [#allocation3 + $0x1], 0 }
   0x5   :  { %14 = vsyncpa [#allocation6], 0 }
   0x6   :  { %16 = vsyncpa [#allocation6 + $0x1], 0 }
   0x7   :  { %17 = vsyncpa [#allocation9], 0 }
   0x8   :  { %18 = vsyncpa [#allocation4], 0 }
   0x9   :  { %20 = vsyncpa [#allocation4 + $0x1], 0  ;;  %s1589_s21 = smov 0   ;;  %s1591_s22 = smov 0  }
   0xa   :  { %s1593_s23 = smov 0   ;;  %s1595_s24 = smov 0  }
   0xb LB: > { %s1610_s25 = sadd.s32 4294967295, %s1532_s24   ;;  %s1049_s26 = sadd.s32 4294967294, %s1532_s24   ;;  %s1532_s24 = sphi %s1595_s24, %s2068_s24   ;;  %s1528_s23 = sphi %s1593_s23, %s2072_s23   ;;  %s1524_s22 = sphi %s1591_s22, %s2071_s22   ;;  %s1520_s21 = sphi %s1589_s21, %s2070_s21  }
   0xc   : > { %p46_p0 = scmp.ne.s32.totalorder %s1524_s22, %s1520_s21  ;;  %p2022_p1 = scmp.eq.s32.totalorder %s1610_s25, 0 }
   0xd   : > { %p191_p3 = scmp.eq.s32.totalorder %s1049_s26, 1  ;;  %p1050_p5 = scmp.ge.s32.totalorder %s1532_s24, 1 }
   0xe   : > { %p1619_p4 = por %p2022_p1, %p46_p0  ;;  %p198_p7 = scmp.lt.s32.totalorder %s1532_s24, 3 }
   0xf   : > { %p1624_p6 = por %p191_p3, %p46_p0  ;;  %s1534_s30 = smov [#allocation8]  }
  0x10   : > { %s2040_s27 = scalar_select %p1619_p4, 1, 0 }
  0x11   : > { %s2041_s28 = scalar_select %p1624_p6, 1, 0 }
  0x12   : > { %p1629_p8 = pnand %p1050_p5, %p198_p7  ;;  %s210_s7 = sshll.u32 %s1534_s30, 4  ;;  %s1633_s7 = int_to_ptr.vmem [resolvable:$true] %s210_s7 }
  0x13   : > { %s1645_s9 = sadd.s32 1, %s1532_s24   ;;  %s33_s10 = sadd.s32 1, %s1528_s23 }
  0x14   : > { %s2042_s29 = scalar_select %p1629_p8, 1, 0 }
  0x15   : > { %p1197_p9 = pneg %p1629_p8  ;;  %2044 = sst [smem:[#allocation16_spill]] %s1645_s9 }
  0x16   : > { %s30_s11 = ssub.s32 %s1532_s24, %s1645_s9  ;;  %s2045_s3 = sld [smem:[#allocation19_spill]] }
  0x17   : > { %p1640_p11 = pnand %p1197_p9, %p2022_p1 }
  0x19   : > { %s2043_s8 = scalar_select %p1640_p11, 1, 0 }
  0x1a   : > { %p2026_p13 = pneg %p1640_p11 }
  0x1c   : > { %s1312_s14 = scalar_lea.hbm %s2045_s3, 512 }
  0x1d   : > { %p1313_p12 = scmp.ne.s32.totalorder %s2045_s3, %s1312_s14  ;;  %p1319_p5 = scmp.lt.u32.totalorder %s1312_s14, %s2045_s3 }
  0x1f   : > { %p1315_p0 = pnand %p2026_p13, %p1313_p12 }
  0x21   : > { %p1316_p3 = pneg %p1315_p0 }
  0x23   : > { %p1321_p7 = pnand %p1319_p5, %p1316_p3 }
  0x25   : > { %1324 = shalt.err (!%p1321_p7)
}
  0x26   : > { %s1325_s19 = scalar_lea.vmem %s1633_s7, 512  ;;  %p1333_p2 = scmp.lt.s32.totalorder %s1633_s7, %s1633_s7 }
  0x27   : > { %p1326_p9 = scmp.ne.s32.totalorder %s1633_s7, %s1325_s19  ;;  %p1334_p12 = scmp.lt.s32.totalorder %s1325_s19, %s1325_s19 }
  0x29   : > { %p1328_p10 = pnand %p1326_p9, %p2026_p13  ;;  %p1335_p0 = por %p1334_p12, %p1333_p2 }
  0x2b   : > { %p1329_p1 = pneg %p1328_p10 }
  0x2d   : > { %p1336_p6 = pnand %p1335_p0, %p1329_p1 }
  0x2f   : > { %1339 = shalt.err (!%p1336_p6)
}
  0x30   : > { %s2024_s20 = smov 128   ;;  %s2025_s26 = smov 8  }
  0x31   : > { %1200 = dma.hbm_to_vmem [thread:$0]  (!%p1640_p11), %s2045_s3, 512, %s1633_s7, [#allocation9], %s2024_s20, %s2024_s20, %s2025_s26  }
  0x32   : > { %p31_p1 = scmp.eq.s32.totalorder %s30_s11, 0  ;;  %p40_p2 = scmp.ne.s32.totalorder %s1528_s23, %s1524_s22 }
  0x33   : > { %p41_p6 = scmp.eq.s32.totalorder %s1532_s24, 0  ;;  %p1220_p10 = scmp.lt.s32.totalorder %s1532_s24, 2 }
  0x34   : > { %s1685_s13 = scalar_select %p31_p1, %s1528_s23, %s33_s10  }
  0x35   : > { %p42_p3 = por %p41_p6, %p40_p2  ;;  %p2047_p5 = scmp.eq.s32.totalorder %s1610_s25, 1 }
  0x36   : > { %2046 = sst [smem:[#allocation17_spill]] %s1685_s13  ;;  %s2023_s15 = sand.u32 1, %s1528_s23  }
  0x37   : > { %p1689_p7 = por %p2047_p5, %p40_p2  ;;  %s1695_s16 = sshll.u32 %s1532_s24, 7 }
  0x38   : > { %s1699_s17 = sshll.u32 %s2023_s15, 3  ;;  %p1701_p9 = pnand %p1220_p10, %p42_p3 }
  0x39   : > { %s2048_s14 = scalar_select %p1689_p7, 1, 0 }
  0x3a   : > { %s2049_s7 = scalar_select %p1701_p9, 1, 0 }
  0x3b   : > { %s258_s10 = sand.u32 1, %s1532_s24   ;;  %s2050_s1 = sld [smem:[#allocation18_spill]] }
  0x3c   : > { %s262_s30 = scalar_lea.vmem [#allocation5], %s1699_s17  ;;  %s1715_s15 = scalar_lea.sflag [#allocation6], %s258_s10 }
  0x3d   : > { %s269_s12 = sshll.u32 %s262_s30, 4  ;;  %p1721_p0 = pneg %p1701_p9  ;;  %s1713_s12 = int_to_ptr.vmem [resolvable:$true] %s269_s12 }
  0x3f   : > { %s2051_s26 = scalar_select %p1721_p0, 1, 0 }
  0x41   : > { %s1710_s19 = scalar_lea.hbm %s2050_s1, %s1695_s16  ;;  %s1345_s3 = scalar_lea.hbm %s2050_s1, 256 }
  0x42   : > { %s1340_s20 = scalar_lea.hbm %s1710_s19, 128  ;;  %p1346_p6 = scmp.lt.u32.totalorder %s1710_s19, %s2050_s1 }
  0x43   : > { %p1341_p12 = scmp.ne.s32.totalorder %s1710_s19, %s1340_s20  ;;  %p1347_p10 = scmp.lt.u32.totalorder %s1345_s3, %s1340_s20 }
  0x44   : > { %p1349_p5 = scmp.lt.u32.totalorder %s1340_s20, %s1710_s19 }
  0x45   : > { %p1343_p1 = pnand %p1721_p0, %p1341_p12  ;;  %p1348_p3 = por %p1347_p10, %p1346_p6 }
  0x47   : > { %p1344_p2 = pneg %p1343_p1  ;;  %p1350_p13 = por %p1349_p5, %p1348_p3 }
  0x49   : > { %p1351_p7 = pnand %p1350_p13, %p1344_p2 }
  0x4b   : > { %1354 = shalt.err (!%p1351_p7)
}
  0x4c   : > { %s1355_s10 = scalar_lea.vmem %s1713_s12, 128  ;;  %s1537_s11 = smov [#allocation5]  }
  0x4d   : > { %p1356_p12 = scmp.ne.s32.totalorder %s1713_s12, %s1355_s10  ;;  %s1360_s18 = sshll.u32 %s1537_s11, 4  ;;  %s1361_s18 = int_to_ptr.vmem [resolvable:$false] %s1360_s18 }
  0x4e   : > { %s1362_s13 = scalar_lea.vmem %s1361_s18, 256  ;;  %p1363_p8 = scmp.lt.s32.totalorder %s1713_s12, %s1361_s18 }
  0x4f   : > { %p1358_p1 = pnand %p1356_p12, %p1721_p0  ;;  %p1364_p11 = scmp.lt.s32.totalorder %s1362_s13, %s1355_s10 }
  0x51   : > { %p1359_p4 = pneg %p1358_p1  ;;  %p1365_p6 = por %p1364_p11, %p1363_p8 }
  0x53   : > { %p1366_p10 = pnand %p1365_p6, %p1359_p4 }
  0x55   : > { %1369 = shalt.err (!%p1366_p10)
}
  0x56   : > { %1210 = dma.hbm_to_vmem [thread:$0]  (!%p1701_p9), %s1710_s19, 128, %s1713_s12, %s1715_s15  }
  0x57   : > { %s1538_s3 = smov [#allocation10]   ;;  %s1370_s11 = scalar_lea.hbm %s2019_s4, 2048 }
  0x58   : > { %s223_s20 = sshll.u32 %s1538_s3, 4  ;;  %p1371_p8 = scmp.ne.s32.totalorder %s2019_s4, %s1370_s11  ;;  %s224_s20 = int_to_ptr.vmem [resolvable:$true] %s223_s20 }
  0x59   : > { %p2052_p4 = scmp.ne.s32.totalorder %s2043_s8, 0  ;;  %p1377_p2 = scmp.lt.u32.totalorder %s1370_s11, %s2019_s4 }
  0x5b   : > { %p2053_p11 = pneg %p2052_p4 }
  0x5d   : > { %p1373_p13 = pnand %p1371_p8, %p2053_p11 }
  0x5f   : > { %p1374_p7 = pneg %p1373_p13 }
  0x61   : > { %p1379_p3 = pnand %p1377_p2, %p1374_p7 }
  0x63   : > { %1382 = shalt.err (!%p1379_p3)
}
  0x64   : > { %s1383_s19 = scalar_lea.vmem %s224_s20, 2048  ;;  %p2054_p12 = pmov %p2053_p11 }
  0x65   : > { %p1384_p5 = scmp.ne.s32.totalorder %s224_s20, %s1383_s19  ;;  %p1391_p10 = scmp.lt.s32.totalorder %s224_s20, %s224_s20 }
  0x66   : > { %p1392_p9 = scmp.lt.s32.totalorder %s1383_s19, %s1383_s19 }
  0x67   : > { %p1386_p1 = pnand %p1384_p5, %p2054_p12 }
  0x68   : > { %p1393_p0 = por %p1392_p9, %p1391_p10 }
  0x69   : > { %p1387_p6 = pneg %p1386_p1 }
  0x6b   : > { %p1394_p8 = pnand %p1393_p0, %p1387_p6 }
  0x6d   : > { %1397 = shalt.err (!%p1394_p8)
}
  0x6e   : > { %s2055_s1 = smov 8   ;;  %s2056_s9 = smov 128  }
  0x6f   : > { %1203 = dma.hbm_to_vmem [thread:$0]  (!%p2052_p4), %s2019_s4, 2048, %s224_s20, [#allocation9], %s2056_s9, %s2056_s9, %s2055_s1  }
  0x70   : > { %s1772_s18 = scalar_lea.hbm %s2015_s0, %s1695_s16  ;;  %s244_s8 = scalar_lea.vmem [#allocation2], %s1699_s17 }
  0x71   : > { %s251_s10 = sshll.u32 %s244_s8, 4  ;;  %s2057_s13 = sand.u32 1, %s1528_s23   ;;  %s252_s10 = int_to_ptr.vmem [resolvable:$true] %s251_s10 }
  0x72   : > { %s241_s19 = scalar_lea.sflag [#allocation3], %s2057_s13  ;;  %s1398_s12 = scalar_lea.hbm %s1772_s18, 128 }
  0x73   : > { %p1399_p9 = scmp.ne.s32.totalorder %s1772_s18, %s1398_s12  ;;  %p2058_p0 = scmp.ne.s32.totalorder %s2051_s26, 0 }
  0x74   : > { %s1403_s9 = scalar_lea.hbm %s2015_s0, 256  ;;  %p1404_p4 = scmp.lt.u32.totalorder %s1772_s18, %s2015_s0 }
  0x75   : > { %p1401_p11 = pnand %p1399_p9, %p2058_p0  ;;  %p1405_p7 = scmp.lt.u32.totalorder %s1403_s9, %s1398_s12 }
  0x76   : > { %p1407_p3 = scmp.lt.u32.totalorder %s1398_s12, %s1772_s18 }
  0x77   : > { %p1402_p13 = pneg %p1401_p11  ;;  %p1406_p2 = por %p1405_p7, %p1404_p4 }
  0x79   : > { %p1408_p5 = por %p1407_p3, %p1406_p2 }
  0x7b   : > { %p1409_p12 = pnand %p1408_p5, %p1402_p13 }
  0x7d   : > { %1412 = shalt.err (!%p1409_p12)
}
  0x7e   : > { %s1413_s11 = scalar_lea.vmem %s252_s10, 128  ;;  %s1539_s8 = smov [#allocation2]  }
  0x7f   : > { %p1414_p1 = scmp.ne.s32.totalorder %s252_s10, %s1413_s11  ;;  %s1418_s13 = sshll.u32 %s1539_s8, 4  ;;  %s1419_s13 = int_to_ptr.vmem [resolvable:$false] %s1418_s13 }
  0x80   : > { %s1420_s20 = scalar_lea.vmem %s1419_s13, 256  ;;  %p1421_p8 = scmp.lt.s32.totalorder %s252_s10, %s1419_s13 }
  0x81   : > { %p1416_p6 = pnand %p1414_p1, %p2058_p0  ;;  %p1422_p9 = scmp.lt.s32.totalorder %s1420_s20, %s1413_s11 }
  0x83   : > { %p1417_p10 = pneg %p1416_p6  ;;  %p1423_p11 = por %p1422_p9, %p1421_p8 }
  0x85   : > { %p1424_p4 = pnand %p1423_p11, %p1417_p10 }
  0x87   : > { %1427 = shalt.err (!%p1424_p4)
}
  0x88   : > { %p2059_p7 = scmp.ne.s32.totalorder %s2049_s7, 0  ;;  %s1798_s9 = scalar_lea.hbm %s2017_s2, %s1695_s16 }
  0x89   : > { %s280_s3 = scalar_lea.vmem [#allocation7], %s1699_s17  ;;  %s1428_s11 = scalar_lea.hbm %s1798_s9, 128 }
  0x8a   : > { %1207 = dma.hbm_to_vmem [thread:$0]  (!%p2059_p7), %s1772_s18, 128, %s252_s10, %s241_s19  }
  0x8b   : > { %s287_s30 = sshll.u32 %s280_s3, 4  ;;  %p1429_p13 = scmp.ne.s32.totalorder %s1798_s9, %s1428_s11  ;;  %s288_s30 = int_to_ptr.vmem [resolvable:$true] %s287_s30 }
  0x8c   : > { %s1433_s18 = scalar_lea.hbm %s2017_s2, 256  ;;  %p1434_p5 = scmp.lt.u32.totalorder %s1798_s9, %s2017_s2 }
  0x8d   : > { %p1431_p2 = pnand %p1429_p13, %p2058_p0  ;;  %p1435_p12 = scmp.lt.u32.totalorder %s1433_s18, %s1428_s11 }
  0x8e   : > { %p1437_p6 = scmp.lt.u32.totalorder %s1428_s11, %s1798_s9 }
  0x8f   : > { %p1432_p3 = pneg %p1431_p2  ;;  %p1436_p1 = por %p1435_p12, %p1434_p5 }
  0x91   : > { %p1438_p10 = por %p1437_p6, %p1436_p1 }
  0x93   : > { %p1439_p8 = pnand %p1438_p10, %p1432_p3 }
  0x95   : > { %1442 = shalt.err (!%p1439_p8)
}
  0x96   : > { %s1443_s16 = scalar_lea.vmem %s288_s30, 128  ;;  %s1540_s17 = smov [#allocation7]  }
  0x97   : > { %p1444_p9 = scmp.ne.s32.totalorder %s288_s30, %s1443_s16  ;;  %s1448_s20 = sshll.u32 %s1540_s17, 4  ;;  %s1449_s20 = int_to_ptr.vmem [resolvable:$false] %s1448_s20 }
  0x98   : > { %s1450_s12 = scalar_lea.vmem %s1449_s20, 256  ;;  %p1451_p13 = scmp.lt.s32.totalorder %s288_s30, %s1449_s20 }
  0x99   : > { %p1446_p11 = pnand %p1444_p9, %p2058_p0  ;;  %p1452_p2 = scmp.lt.s32.totalorder %s1450_s12, %s1443_s16 }
  0x9b   : > { %p1447_p4 = pneg %p1446_p11  ;;  %p1453_p7 = por %p1452_p2, %p1451_p13 }
  0x9d   : > { %p1454_p5 = pnand %p1453_p7, %p1447_p4 }
  0x9f   : > { %1457 = shalt.err (!%p1454_p5)
}
  0xa0   : > { %p2060_p12 = scmp.ne.s32.totalorder %s2049_s7, 0  ;;  %p2061_p3 = scmp.ne.s32.totalorder %s2042_s29, 0 }
  0xa1   : > { %s1822_s26 = sand.u32 (!%p2061_p3), 1, %s1524_s22   ;;  %p2062_p0 = scmp.ne.s32.totalorder (!%p2061_p3), %s2040_s27, 0 }
  0xa2   : > { %1213 = dma.hbm_to_vmem [thread:$0]  (!%p2060_p12), %s1798_s9, 128, %s288_s30, %s1715_s15  }
  0xa3   : > { %296 = sbr.rel (%p2061_p3) target bundleno = 1446 (0x5a6), region = 44  ;;  %s1825_s1 = sshll.u32 (!%p2061_p3), %s1822_s26, 3 }
  0xa4   : > { %s299_s3 = scalar_lea.sflag (!%p2061_p3), [#allocation3], %s1822_s26  ;;  %s302_s11 = scalar_lea.vmem (!%p2061_p3), [#allocation2], %s1825_s1 }
  0xaa   : > { %1503 = dma.done.wait (%p2062_p0), %s299_s3, 128  }
  0xab   : > { %1505 = vsyncadd (%p2062_p0), %s299_s3, 4294967168  ;;  %s307_s29 = sand.u32 1, %s1610_s25   ;;  %s311_s7 = scalar_lea.vmem [#allocation5], %s1825_s1 }
  0xac   : > { %s308_s15 = scalar_lea.sflag [#allocation6], %s307_s29 }
  0xad   : > { %1507 = dma.done.wait (%p2062_p0), %s308_s15, 256  }
  0xae   : > { %1509 = vsyncadd (%p2062_p0), %s308_s15, 4294967040  ;;  %s320_s9 = scalar_lea.vmem [#allocation7], %s1825_s1  ;;  %p2063_p7 = scmp.eq.s32.totalorder %s1610_s25, 0 }
  0xb0   : > { %1511 = dma.done.wait (%p2063_p7), [#allocation9], 2560   ;;  %p2064_p1 = pmov %p2063_p7 }
  0xb1   : > { %v1541_v0 = vmov 0.0|0.0   ;;  %vm1542_vm0 = vmmov 0   ;;  %v1543_v1 = vmov 0.0   ;;  %v370_v2 = vld [vmem:[#allocation8] sm:$0xff]  ;;  %v371_v3 = vld [vmem:[#allocation8 + $0x8] sm:$0xff]  ;;  %v372_v4 = vld [vmem:[#allocation8 + $0x10] sm:$0xff] }
  0xb2   : > { %1513 = vsyncadd (%p2064_p1), [#allocation9], 4294964736  ;;  %1151 = vmatprep.subr.bf16.mxu0 %v1541_v0  ;;  %1107 = vmatprep.mubr.msk.f32.mxu0 %vm1542_vm0, %v1543_v1  ;;  %v1152_v5 = vpack.c.bf16 %v371_v3, %v370_v2  ;;  %v373_v6 = vld [vmem:[#allocation8 + $0x18] sm:$0xff]  ;;  %vm374_vm1 = vcmask 261120   ;;  %v368_v9 = vld [vmem:[%s311_s7] sm:$0xff]  ;;  %s1544_s27 = smov 120  }
  0xb3   : > { %1157 = vmatprep.subr.bf16.mxu1 %v1541_v0  ;;  %1148 = vmatprep.mubr.msk.f32.mxu1 %vm1542_vm0, %v1543_v1  ;;  %v1155_v7 = vpack.c.bf16 %v373_v6, %v372_v4  ;;  %v367_v8 = vld [vmem:[%s302_s11] sm:$0xff]  ;;  %s1545_s30 = smov 8   ;;  %s1546_s8 = smov 24   ;;  %vm465_vm2 = vcmask 64512   ;;  %vm782_vm3 = vcmask 130048   ;;  %vm784_vm4 = vcmask 195584  }
  0xb4   : > { %1153 = vmatpush3.bf16.msra.mxu0 %v1152_v5  ;;  %s1547_s13 = smov 16   ;;  %s1548_s18 = smov 112   ;;  %v369_v15 = vld [vmem:[%s320_s9] sm:$0xff]  ;;  %vm800_vm5 = vcmask 523264   ;;  %vm802_vm6 = vcmask 785408   ;;  %vm807_vm7 = vcmask 1040384  }
  0xb5   : > { %1154 = vmatprep.subr.bf16.mxu0 %v1541_v0  ;;  %s1549_s10 = smov 104   ;;  %s1550_s19 = smov 64  }
  0xb6   : > { %s1551_s16 = smov 32   ;;  %s1552_s17 = smov 96  }
  0xb7   : > { %s1066_s20 = sshll.u32 %s1822_s26, 1  ;;  %s1072_s3 = sshll.u32 %s1610_s25, 5 }
  0xb8   : > { %1156 = vmatpush3.bf16.msra.mxu0 %v1155_v7  ;;  %s366_s11 = scalar_lea.vmem [#allocation11], %s1066_s20  ;;  %s1971_s9 = scalar_lea.hbm %s2021_s6, %s1072_s3 }
  0xb9   : > { %s917_s29 = sshll.u32 %s366_s11, 4  ;;  %p2065_p10 = scmp.ne.s32.totalorder %s2048_s14, 0  ;;  %s1973_s29 = int_to_ptr.vmem [resolvable:$true] %s917_s29 }
  0xba   : > { %s1553_s25 = smov [#allocation11]  }
  0xbb   : > { %1108 = vmatmul.mubr.msk.f32.vlgmr.msra.gmra.mrb[0].mxu0 %vm374_vm1, %v367_v8 }
  0xbc   : > { %1110 = vmatprep.mubr.msk.f32.mxu0 %vm1542_vm0, %v1543_v1 }
  0xbf   : > { %1111 = vmatmul.mubr.msk.f32.gmra.mrb[2].mxu0 %vm374_vm1, %v368_v9 }
  0xc0   : > { %1113 = vmatprep.mubr.msk.f32.mxu0 %vm1542_vm0, %v1543_v1 }
  0xc3   : > { %1114 = vmatmul.mubr.msk.f32.gmra.mrb[4].mxu0 %vm374_vm1, %v369_v15 }
 0x18e   : > { %v450_v10 = vpop.f32.mrb[0].mxu0 }
 0x18f   : > { %471 = vrot.lane.b32.xlu1 %v450_v10, %s1544_s27  ;;  %538 = vrot.lane.b32.xlu0 %v450_v10, %s1545_s30  ;;  %v1109_v11 = vpop.f32.mrb[1].mxu0 }
 0x192   : > { %v1855_v12 = vpop.f32.mrb[2].mxu0 }
 0x193   : > { %693 = vrot.lane.b32.xlu1 %v450_v10, %s1546_s8  ;;  %617 = vrot.lane.b32.xlu0 %v450_v10, %s1547_s13  ;;  %v1860_v13 = vmul.f32 %v1855_v12, %v450_v10  ;;  %v1112_v14 = vpop.f32.mrb[3].mxu0 }
 0x195   : > { %v466_v50 = vsel %vm465_vm2, %v1860_v13, 0.0 }
 0x196   : > { %v1905_v56 = vpop.f32.mrb[4].mxu0 }
 0x197   : > { %479 = vrot.lane.b32.xlu0 %v450_v10, %s1548_s18  ;;  %v1115_v57 = vpop.f32.mrb[5].mxu0 }
 0x19b   : > { %551 = vrot.lane.b32.xlu0 %v1860_v13, %s1544_s27 }
 0x19f   : > { %636 = vrot.lane.b32.xlu0 %v1860_v13, %s1548_s18 }
 0x201   : > { %v472_v16 = vpop.permute.xlu1 %471  ;;  %v539_v17 = vpop.permute.xlu0 %538 }
 0x202   : > { %v541_v18 = vmul.f32 %v539_v17, %v1855_v12  ;;  %v474_v23 = vmul.f32 %v472_v16, %v1855_v12 }
 0x204   : > { %543 = vrot.lane.b32.xlu1 %v541_v18, %s1544_s27  ;;  %629 = vrot.lane.b32.xlu0 %v541_v18, %s1548_s18  ;;  %v475_v51 = vsel %vm465_vm2, %v474_v23, 0.0 }
 0x205   : > { %v694_v19 = vpop.permute.xlu1 %693  ;;  %v618_v20 = vpop.permute.xlu0 %617 }
 0x206   : > { %v696_v21 = vmul.f32 %v694_v19, %v1855_v12  ;;  %v620_v22 = vmul.f32 %v618_v20, %v1855_v12 }
 0x208   : > { %622 = vrot.lane.b32.xlu1 %v620_v22, %s1548_s18  ;;  %698 = vrot.lane.b32.xlu0 %v696_v21, %s1549_s10 }
 0x209   : > { %v480_v24 = vpop.permute.xlu0 %479 }
 0x20a   : > { %v482_v25 = vmul.f32 %v480_v24, %v1855_v12 }
 0x20c   : > { %559 = vrot.lane.b32.xlu1 %v474_v23, %s1544_s27  ;;  %712 = vrot.lane.b32.xlu0 %v541_v18, %s1549_s10  ;;  %v483_v54 = vsel %vm465_vm2, %v482_v25, 0.0 }
 0x20d   : > { %v552_v26 = vpop.permute.xlu0 %551 }
 0x20e   : > { %v554_v27 = vsel %vm465_vm2, %v552_v26, 0.0 }
 0x210   : > { %705 = vrot.lane.b32.xlu1 %v620_v22, %s1549_s10  ;;  %719 = vrot.lane.b32.xlu0 %v1860_v13, %s1549_s10 }
 0x211   : > { %v637_v28 = vpop.permute.xlu0 %636 }
 0x212   : > { %v639_v29 = vsel %vm465_vm2, %v637_v28, 0.0 }
 0x214   : > { %567 = vrot.lane.b32.xlu1 %v482_v25, %s1544_s27  ;;  %487 = vrot.lane.b32.xlu0 %v450_v10, %s1549_s10 }
 0x218   : > { %643 = vrot.lane.b32.xlu1 %v474_v23, %s1548_s18 }
 0x233   : > { %555 = vadd.xlane.f32.xlu0 %v554_v27 }
 0x23c   : > { %640 = vadd.xlane.f32.xlu1 %v639_v29 }
 0x276   : > { %v544_v30 = vpop.permute.xlu1 %543  ;;  %v630_v34 = vpop.permute.xlu0 %629 }
 0x277   : > { %v546_v31 = vsel %vm465_vm2, %v544_v30, 0.0  ;;  %v632_v36 = vsel %vm465_vm2, %v630_v34, 0.0 }
 0x278   : > { %547 = vadd.xlane.f32.xlu1 %v546_v31 }
 0x27a   : > { %v623_v32 = vpop.permute.xlu1 %622  ;;  %v699_v39 = vpop.permute.xlu0 %698 }
 0x27b   : > { %v625_v33 = vsel %vm465_vm2, %v623_v32, 0.0  ;;  %v701_v42 = vsel %vm465_vm2, %v699_v39, 0.0 }
 0x27c   : > { %626 = vadd.xlane.f32.xlu1 %v625_v33 }
 0x27e   : > { %v560_v35 = vpop.permute.xlu1 %559  ;;  %v713_v44 = vpop.permute.xlu0 %712 }
 0x27f   : > { %v562_v38 = vsel %vm465_vm2, %v560_v35, 0.0  ;;  %v715_v45 = vsel %vm465_vm2, %v713_v44, 0.0 }
 0x280   : > { %633 = vadd.xlane.f32.xlu1 %v632_v36 }
 0x282   : > { %v706_v37 = vpop.permute.xlu1 %705  ;;  %v720_v48 = vpop.permute.xlu0 %719 }
 0x283   : > { %v708_v43 = vsel %vm465_vm2, %v706_v37, 0.0  ;;  %v722_v49 = vsel %vm465_vm2, %v720_v48, 0.0 }
 0x284   : > { %563 = vadd.xlane.f32.xlu1 %v562_v38 }
 0x286   : > { %v568_v40 = vpop.permute.xlu1 %567  ;;  %v488_v52 = vpop.permute.xlu0 %487 }
 0x287   : > { %v570_v41 = vsel %vm465_vm2, %v568_v40, 0.0  ;;  %v490_v53 = vmul.f32 %v488_v52, %v1855_v12 }
 0x288   : > { %571 = vadd.xlane.f32.xlu0 %v570_v41  ;;  %702 = vadd.xlane.f32.xlu1 %v701_v42 }
 0x289   : > { %v491_v55 = vsel %vm465_vm2, %v490_v53, 0.0 }
 0x28a   : > { %v644_v46 = vpop.permute.xlu1 %643 }
 0x28b   : > { %v646_v47 = vsel %vm465_vm2, %v644_v46, 0.0 }
 0x28c   : > { %709 = vadd.xlane.f32.xlu1 %v708_v43 }
 0x290   : > { %716 = vadd.xlane.f32.xlu1 %v715_v45 }
 0x294   : > { %647 = vadd.xlane.f32.xlu1 %v646_v47 }
 0x298   : > { %723 = vadd.xlane.f32.xlu1 %v722_v49 }
 0x29c   : > { %467 = vadd.xlane.f32.xlu1 %v466_v50 }
 0x2a0   : > { %476 = vadd.xlane.f32.xlu1 %v475_v51 }
 0x2a4   : > { %484 = vadd.xlane.f32.xlu1 %v483_v54 }
 0x2a8   : > { %492 = vadd.xlane.f32.xlu1 %v491_v55 }
 0x2c0   : > { %v556_v62 = vpop.xlane.xlu0 %555 }
 0x2c1   : > { %v557_v2 = vmul.f32 0.35355338, %v556_v62 }
 0x2c9   : > { %v641_v58 = vpop.xlane.xlu1 %640 }
 0x2ca   : > { %v642_v23 = vmul.f32 0.35355338, %v641_v58 }
 0x305   : > { %v548_v59 = vpop.xlane.xlu1 %547 }
 0x306   : > { %v549_v63 = vmul.f32 0.35355338, %v548_v59 }
 0x308   : > { %v574_v4 = vmax.f32 %v549_v63, %v557_v2 }
 0x309   : > { %v627_v60 = vpop.xlane.xlu1 %626 }
 0x30a   : > { %v628_v16 = vmul.f32 0.35355338, %v627_v60 }
 0x30d   : > { %v634_v61 = vpop.xlane.xlu1 %633 }
 0x30e   : > { %v635_v11 = vmul.f32 0.35355338, %v634_v61 }
 0x310   : > { %v650_v21 = vmax.f32 %v628_v16, %v635_v11 }
 0x311   : > { %v564_v1 = vpop.xlane.xlu1 %563 }
 0x312   : > { %v565_v3 = vmul.f32 0.35355338, %v564_v1  ;;  %v651_v26 = vmax.f32 %v650_v21, %v642_v23 }
 0x314   : > { %v575_v7 = vmax.f32 %v574_v4, %v565_v3 }
 0x315   : > { %v703_v5 = vpop.xlane.xlu1 %702  ;;  %v572_v6 = vpop.xlane.xlu0 %571 }
 0x316   : > { %v573_v8 = vmul.f32 0.35355338, %v572_v6  ;;  %v704_v28 = vmul.f32 0.35355338, %v703_v5 }
 0x318   : > { %v576_v9 = vmax.f32 %v575_v7, %v573_v8 }
 0x319   : > { %v710_v10 = vpop.xlane.xlu1 %709 }
 0x31a   : > { %v577_v12 = vsub.f32 %v549_v63, %v576_v9  ;;  %v580_v13 = vsub.f32 %v557_v2, %v576_v9  ;;  %v583_v14 = vsub.f32 %v565_v3, %v576_v9  ;;  %v586_v15 = vsub.f32 %v573_v8, %v576_v9 }
 0x31b   : > { %v711_v24 = vmul.f32 0.35355338, %v710_v10 }
 0x31c   : > { %v578_v17 = vmul.f32 1.442695, %v577_v12  ;;  %v581_v18 = vmul.f32 1.442695, %v580_v13  ;;  %v584_v19 = vmul.f32 1.442695, %v583_v14 }
 0x31d   : > { %v717_v20 = vpop.xlane.xlu1 %716  ;;  %v587_v22 = vmul.f32 1.442695, %v586_v15  ;;  %v726_v31 = vmax.f32 %v704_v28, %v711_v24 }
 0x31e   : > { %1272 = vpow2.f32 %v578_v17  ;;  %v718_v29 = vmul.f32 0.35355338, %v717_v20 }
 0x31f   : > { %1274 = vpow2.f32 %v581_v18 }
 0x320   : > { %1276 = vpow2.f32 %v584_v19  ;;  %v727_v37 = vmax.f32 %v726_v31, %v718_v29 }
 0x321   : > { %v648_v25 = vpop.xlane.xlu1 %647  ;;  %1278 = vpow2.f32 %v587_v22 }
 0x322   : > { %v649_v27 = vmul.f32 0.35355338, %v648_v25 }
 0x324   : > { %v652_v30 = vmax.f32 %v651_v26, %v649_v27 }
 0x325   : > { %v724_v32 = vpop.xlane.xlu1 %723 }
 0x326   : > { %v653_v33 = vsub.f32 %v628_v16, %v652_v30  ;;  %v656_v34 = vsub.f32 %v635_v11, %v652_v30  ;;  %v659_v35 = vsub.f32 %v642_v23, %v652_v30  ;;  %v662_v36 = vsub.f32 %v649_v27, %v652_v30 }
 0x327   : > { %v725_v38 = vmul.f32 0.35355338, %v724_v32 }
 0x328   : > { %v1907_v39 = vpop.eup %1272  ;;  %v654_v40 = vmul.f32 1.442695, %v653_v33  ;;  %v657_v41 = vmul.f32 1.442695, %v656_v34  ;;  %v660_v43 = vmul.f32 1.442695, %v659_v35 }
 0x329   : > { %v1275_v42 = vpop.eup %1274  ;;  %v728_v44 = vmax.f32 %v727_v37, %v725_v38  ;;  %v468_v45 = vpop.xlane.xlu1 %467  ;;  %v663_v47 = vmul.f32 1.442695, %v662_v36 }
 0x32a   : > { %v589_v46 = vadd.f32 %v1275_v42, %v1907_v39  ;;  %1280 = vpow2.f32 %v654_v40  ;;  %v1910_v48 = vpop.eup %1276  ;;  %v469_v1 = vmul.f32 0.35355338, %v468_v45 }
 0x32b   : > { %1282 = vpow2.f32 %v657_v41  ;;  %v729_v49 = vsub.f32 %v704_v28, %v728_v44  ;;  %v732_v50 = vsub.f32 %v711_v24, %v728_v44  ;;  %v735_v51 = vsub.f32 %v718_v29, %v728_v44  ;;  %v1913_v53 = vpop.eup %1278 }
 0x32c   : > { %v590_v52 = vadd.f32 %v1910_v48, %v589_v46  ;;  %1284 = vpow2.f32 %v660_v43  ;;  %v738_v57 = vsub.f32 %v725_v38, %v728_v44 }
 0x32d   : > { %v730_v54 = vmul.f32 1.442695, %v729_v49  ;;  %v733_v55 = vmul.f32 1.442695, %v732_v50  ;;  %v477_v58 = vpop.xlane.xlu1 %476  ;;  %1286 = vpow2.f32 %v663_v47  ;;  %v736_v60 = vmul.f32 1.442695, %v735_v51 }
 0x32e   : > { %v591_v59 = vadd.f32 %v1913_v53, %v590_v52  ;;  %v478_v61 = vmul.f32 0.35355338, %v477_v58  ;;  %v739_v62 = vmul.f32 1.442695, %v738_v57 }
 0x32f   : > { %1288 = vpow2.f32 %v730_v54 }
 0x330   : > { %1290 = vrcp.f32 %v591_v59  ;;  %v495_v4 = vmax.f32 %v469_v1, %v478_v61 }
 0x331   : > { %1292 = vpow2.f32 %v733_v55  ;;  %v485_v63 = vpop.xlane.xlu1 %484 }
 0x332   : > { %v486_v2 = vmul.f32 0.35355338, %v485_v63  ;;  %1294 = vpow2.f32 %v736_v60 }
 0x333   : > { %1296 = vpow2.f32 %v739_v62 }
 0x334   : > { %v1281_v3 = vpop.eup %1280  ;;  %v496_v8 = vmax.f32 %v495_v4, %v486_v2 }
 0x335   : > { %v1283_v5 = vpop.eup %1282  ;;  %v493_v6 = vpop.xlane.xlu1 %492 }
 0x336   : > { %v665_v7 = vadd.f32 %v1283_v5, %v1281_v3  ;;  %v494_v9 = vmul.f32 0.35355338, %v493_v6  ;;  %v1285_v10 = vpop.eup %1284 }
 0x337   : > { %v1916_v11 = vpop.eup %1286 }
 0x338   : > { %v666_v12 = vadd.f32 %v1285_v10, %v665_v7  ;;  %v497_v13 = vmax.f32 %v496_v8, %v494_v9 }
 0x339   : > { %v1289_v14 = vpop.eup %1288 }
 0x33a   : > { %v1291_v15 = vpop.eup %1290  ;;  %v667_v16 = vadd.f32 %v1916_v11, %v666_v12  ;;  %v498_v17 = vsub.f32 %v469_v1, %v497_v13  ;;  %v501_v18 = vsub.f32 %v478_v61, %v497_v13  ;;  %v504_v19 = vsub.f32 %v486_v2, %v497_v13 }
 0x33b   : > { %v1293_v20 = vpop.eup %1292  ;;  %v507_v21 = vsub.f32 %v494_v9, %v497_v13  ;;  %v596_v22 = vmul.f32 %v1291_v15, %v1275_v42  ;;  %v594_v30 = vmul.f32 %v1291_v15, %v1907_v39  ;;  %v603_v43 = vmul.f32 %v1291_v15, %v1910_v48 }
 0x33c   : > { %1298 = vrcp.f32 %v667_v16  ;;  %v741_v23 = vadd.f32 %v1293_v20, %v1289_v14  ;;  %v499_v24 = vmul.f32 1.442695, %v498_v17  ;;  %v502_v25 = vmul.f32 1.442695, %v501_v18  ;;  %v1295_v26 = vpop.eup %1294 }
 0x33d   : > { %v505_v27 = vmul.f32 1.442695, %v504_v19  ;;  %v597_v28 = vmul.f32 %v596_v22, %v1905_v56  ;;  %v1297_v31 = vpop.eup %1296  ;;  %v508_v32 = vmul.f32 1.442695, %v507_v21  ;;  %v595_v34 = vmul.f32 %v594_v30, %v1905_v56 }
 0x33e   : > { %v742_v29 = vadd.f32 %v1295_v26, %v741_v23  ;;  %1300 = vpow2.f32 %v499_v24  ;;  %v604_v51 = vmul.f32 %v603_v43, %v1905_v56  ;;  %v610_v61 = vmul.f32 %v1291_v15, %v1913_v53  ;;  %v809_v24 = vld [vmem:[#allocation10] sm:$0xff]  ;;  %v819_v43 = vld [vmem:[#allocation10 + $0x50] sm:$0xff] }
 0x33f   : > { %1302 = vpow2.f32 %v502_v25  ;;  %599 = vrot.lane.b32.xlu0 %v597_v28, %s1544_s27  ;;  %v810_v25 = vld [vmem:[#allocation10 + $0x8] sm:$0xff]  ;;  %v812_v28 = vld [vmem:[#allocation10 + $0x18] sm:$0xff] }
 0x340   : > { %v743_v33 = vadd.f32 %v1297_v31, %v742_v29  ;;  %1304 = vpow2.f32 %v505_v27  ;;  %v611_v63 = vmul.f32 %v610_v61, %v1905_v56 }
 0x342   : > { %1306 = vrcp.f32 %v743_v33 }
 0x343   : > { %1308 = vpow2.f32 %v508_v32 }
 0x346   : > { %v1299_v35 = vpop.eup %1298 }
 0x347   : > { %v672_v36 = vmul.f32 %v1299_v35, %v1283_v5  ;;  %v679_v37 = vmul.f32 %v1299_v35, %v1285_v10  ;;  %v670_v38 = vmul.f32 %v1299_v35, %v1281_v3  ;;  %v686_v1 = vmul.f32 %v1299_v35, %v1916_v11  ;;  %v814_v35 = vld [vmem:[#allocation10 + $0x28] sm:$0xff] }
 0x348   : > { %v1301_v40 = vpop.eup %1300 }
 0x349   : > { %v1303_v41 = vpop.eup %1302  ;;  %v673_v42 = vmul.f32 %v672_v36, %v1905_v56  ;;  %v680_v39 = vmul.f32 %v679_v37, %v1905_v56  ;;  %v671_v44 = vmul.f32 %v670_v38, %v1905_v56  ;;  %v687_v2 = vmul.f32 %v686_v1, %v1905_v56  ;;  %v815_v37 = vld [vmem:[#allocation10 + $0x30] sm:$0xff]  ;;  %v816_v38 = vld [vmem:[#allocation10 + $0x38] sm:$0xff] }
 0x34a   : > { %v510_v45 = vadd.f32 %v1303_v41, %v1301_v40  ;;  %v1305_v46 = vpop.eup %1304 }
 0x34b   : > { %675 = vrot.lane.b32.xlu1 %v673_v42, %s1544_s27  ;;  %682 = vrot.lane.b32.xlu0 %v680_v39, %s1548_s18  ;;  %v818_v42 = vld [vmem:[#allocation10 + $0x48] sm:$0xff] }
 0x34c   : > { %v1307_v47 = vpop.eup %1306  ;;  %v511_v49 = vadd.f32 %v1305_v46, %v510_v45 }
 0x34d   : > { %v1309_v50 = vpop.eup %1308  ;;  %v755_v52 = vmul.f32 %v1307_v47, %v1295_v26  ;;  %v748_v54 = vmul.f32 %v1307_v47, %v1293_v20  ;;  %v746_v55 = vmul.f32 %v1307_v47, %v1289_v14  ;;  %v762_v58 = vmul.f32 %v1307_v47, %v1297_v31  ;;  %v811_v26 = vld [vmem:[#allocation10 + $0x10] sm:$0xff] }
 0x34e   : > { %v512_v57 = vadd.f32 %v1309_v50, %v511_v49  ;;  %v1161_v33 = vpack.c.bf16 %v812_v28, %v811_v26 }
 0x34f   : > { %606 = vrot.lane.b32.xlu1 %v604_v51, %s1548_s18  ;;  %v756_v48 = vmul.f32 %v755_v52, %v1905_v56  ;;  %v747_v59 = vmul.f32 %v746_v55, %v1905_v56  ;;  %v749_v60 = vmul.f32 %v748_v54, %v1905_v56  ;;  %v763_v62 = vmul.f32 %v762_v58, %v1905_v56  ;;  %v822_v51 = vld [vmem:[#allocation10 + $0x68] sm:$0xff]  ;;  %v824_v58 = vld [vmem:[#allocation10 + $0x78] sm:$0xff] }
 0x350   : > { %1310 = vrcp.f32 %v512_v57 }
 0x351   : > { %758 = vrot.lane.b32.xlu0 %v756_v48, %s1548_s18  ;;  %v823_v48 = vld [vmem:[#allocation10 + $0x70] sm:$0xff] }
 0x353   : > { %751 = vrot.lane.b32.xlu1 %v749_v60, %s1544_s27  ;;  %v1179_v60 = vpack.c.bf16 %v824_v58, %v823_v48 }
 0x355   : > { %765 = vrot.lane.b32.xlu0 %v763_v62, %s1549_s10 }
 0x357   : > { %613 = vrot.lane.b32.xlu1 %v611_v63, %s1549_s10 }
 0x35a   : > { %v1311_v3 = vpop.eup %1310 }
 0x35b   : > { %689 = vrot.lane.b32.xlu1 %v687_v2, %s1549_s10  ;;  %v524_v4 = vmul.f32 %v1311_v3, %v1305_v46  ;;  %v517_v5 = vmul.f32 %v1311_v3, %v1303_v41  ;;  %v515_v53 = vmul.f32 %v1311_v3, %v1301_v40  ;;  %v531_v8 = vmul.f32 %v1311_v3, %v1309_v50  ;;  %v817_v41 = vld [vmem:[#allocation10 + $0x40] sm:$0xff] }
 0x35c   : > { %v1167_v40 = vpack.c.bf16 %v816_v38, %v815_v37  ;;  %v1170_v39 = vpack.c.bf16 %v818_v42, %v817_v41  ;;  %v821_v50 = vld [vmem:[#allocation10 + $0x60] sm:$0xff] }
 0x35d   : > { %v525_v6 = vmul.f32 %v524_v4, %v1905_v56  ;;  %v518_v7 = vmul.f32 %v517_v5, %v1905_v56  ;;  %v516_v9 = vmul.f32 %v515_v53, %v1905_v56  ;;  %v532_v10 = vmul.f32 %v531_v8, %v1905_v56 }
 0x35e   : > { %v1158_v56 = vpack.c.bf16 %v810_v25, %v809_v24  ;;  %v1176_v52 = vpack.c.bf16 %v822_v51, %v821_v50 }
 0x35f   : > { %527 = vrot.lane.b32.xlu0 %v525_v6, %s1548_s18  ;;  %520 = vrot.lane.b32.xlu1 %v518_v7, %s1544_s27  ;;  %s904_s27 = scalar_lea.sflag [#allocation4], %s1822_s26 }
 0x360   : > { %1159 = vmatpush3.bf16.msra.mxu1 %v1158_v56 }
 0x361   : > { %1160 = vmatprep.subr.bf16.mxu1 %v1541_v0 }
 0x363   : > { %534 = vrot.lane.b32.xlu1 %v532_v10, %s1549_s10 }
 0x364   : > { %1162 = vmatpush3.bf16.msra.mxu1 %v1161_v33 }
 0x365   : > { %1163 = vmatprep.subr.bf16.mxu1 %v1541_v0 }
 0x3b1   : > { %v600_v11 = vpop.permute.xlu0 %599 }
 0x3b2   : > { %v602_v16 = vadd.f32 %v600_v11, %v595_v34  ;;  %v813_v34 = vld [vmem:[#allocation10 + $0x20] sm:$0xff] }
 0x3b3   : > { %v1164_v36 = vpack.c.bf16 %v814_v35, %v813_v34 }
 0x3b5   : > { %1165 = vmatpush3.bf16.msra.mxu1 %v1164_v36 }
 0x3b6   : > { %1166 = vmatprep.subr.bf16.mxu1 %v1541_v0 }
 0x3b9   : > { %1168 = vmatpush3.bf16.msra.mxu1 %v1167_v40 }
 0x3ba   : > { %1169 = vmatprep.subr.bf16.mxu1 %v1541_v0 }
 0x3bd   : > { %v676_v12 = vpop.permute.xlu1 %675  ;;  %v683_v13 = vpop.permute.xlu0 %682  ;;  %1171 = vmatpush3.bf16.msra.mxu1 %v1170_v39 }
 0x3be   : > { %v678_v19 = vadd.f32 %v676_v12, %v671_v44  ;;  %v820_v44 = vld [vmem:[#allocation10 + $0x58] sm:$0xff]  ;;  %1172 = vmatprep.subr.bf16.mxu1 %v1541_v0  ;;  %v1070_v12 = vld [vmem:[%s2020_s5] ss:$0 sm:$0xff] }
 0x3bf   : > { %v1173_v45 = vpack.c.bf16 %v820_v44, %v819_v43 }
 0x3c0   : > { %v685_v27 = vadd.f32 %v683_v13, %v678_v19 }
 0x3c1   : > { %v607_v14 = vpop.permute.xlu1 %606  ;;  %1174 = vmatpush3.bf16.msra.mxu1 %v1173_v45 }
 0x3c2   : > { %v609_v20 = vadd.f32 %v607_v14, %v602_v16  ;;  %1175 = vmatprep.subr.bf16.mxu1 %v1541_v0 }
 0x3c3   : > { %v759_v18 = vpop.permute.xlu0 %758 }
 0x3c5   : > { %v752_v15 = vpop.permute.xlu1 %751  ;;  %1177 = vmatpush3.bf16.msra.mxu1 %v1176_v52 }
 0x3c6   : > { %v754_v17 = vadd.f32 %v752_v15, %v747_v59  ;;  %1178 = vmatprep.subr.bf16.mxu1 %v1541_v0 }
 0x3c7   : > { %v766_v29 = vpop.permute.xlu0 %765 }
 0x3c8   : > { %v761_v22 = vadd.f32 %v759_v18, %v754_v17 }
 0x3c9   : > { %v614_v21 = vpop.permute.xlu1 %613  ;;  %1180 = vmatpush3.bf16.msra.mxu1 %v1179_v60 }
 0x3ca   : > { %v616_v23 = vadd.f32 %v614_v21, %v609_v20  ;;  %v768_v31 = vadd.f32 %v766_v29, %v761_v22 }
 0x3cc   : > { %770 = vrot.lane.b32.xlu0 %v616_v23, %s1545_s30  ;;  %s1458_s30 = scalar_lea.vmem %s1973_s29, 32 }
 0x3cd   : > { %v690_v30 = vpop.permute.xlu1 %689  ;;  %p1459_p6 = scmp.ne.s32.totalorder %s1973_s29, %s1458_s30 }
 0x3ce   : > { %v692_v32 = vadd.f32 %v690_v30, %v685_v27 }
 0x3cf   : > { %p1460_p8 = pnand %p1459_p6, %p2065_p10 }
 0x3d0   : > { %778 = vrot.lane.b32.xlu0 %v768_v31, %s1546_s8  ;;  %774 = vrot.lane.b32.xlu1 %v692_v32, %s1547_s13  ;;  %s1462_s8 = sshll.u32 %s1553_s25, 4  ;;  %s1463_s8 = int_to_ptr.vmem [resolvable:$false] %s1462_s8 }
 0x3d1   : > { %v521_v46 = vpop.permute.xlu1 %520  ;;  %v528_v49 = vpop.permute.xlu0 %527  ;;  %p1461_p9 = pneg %p1460_p8  ;;  %s1464_s13 = scalar_lea.vmem %s1463_s8, 64 }
 0x3d2   : > { %v523_v47 = vadd.f32 %v521_v46, %v516_v9  ;;  %p1465_p11 = scmp.lt.s32.totalorder %s1973_s29, %s1463_s8  ;;  %p1466_p4 = scmp.lt.s32.totalorder %s1464_s13, %s1458_s30 }
 0x3d4   : > { %v530_v54 = vadd.f32 %v528_v49, %v523_v47  ;;  %p1467_p13 = por %p1466_p4, %p1465_p11 }
 0x3d5   : > { %v535_v55 = vpop.permute.xlu1 %534 }
 0x3d6   : > { %v537_v59 = vadd.f32 %v535_v55, %v530_v54  ;;  %p1468_p2 = pnand %p1467_p13, %p1461_p9 }
 0x43e   : > { %v771_v57 = vpop.permute.xlu0 %770 }
 0x43f   : > { %v781_v61 = vsel %vm465_vm2, %v537_v59, %v771_v57 }
 0x442   : > { %v779_v62 = vpop.permute.xlu0 %778  ;;  %v775_v63 = vpop.permute.xlu1 %774 }
 0x443   : > { %v783_v1 = vsel %vm782_vm3, %v781_v61, %v775_v63 }
 0x444   : > { %v785_v2 = vsel %vm784_vm4, %v783_v1, %v779_v62 }
 0x445   : > { %v791_v3 = vrot.slane %v785_v2, 2  ;;  %v787_v4 = vrot.slane %v785_v2, 1  ;;  %v795_v0 = vrot.slane %v785_v2, 3 }
 0x447   : > { %792 = vrot.lane.b32.xlu0 %v791_v3, %s1550_s19  ;;  %788 = vrot.lane.b32.xlu1 %v787_v4, %s1551_s16 }
 0x44b   : > { %796 = vrot.lane.b32.xlu1 %v795_v0, %s1552_s17 }
 0x4b9   : > { %v789_v5 = vpop.permute.xlu1 %788  ;;  %v793_v53 = vpop.permute.xlu0 %792 }
 0x4ba   : > { %v799_v6 = vsel %vm374_vm1, %v785_v2, %v789_v5 }
 0x4bb   : > { %v801_v7 = vsel %vm800_vm5, %v799_v6, %v793_v53 }
 0x4bd   : > { %v797_v8 = vpop.permute.xlu1 %796 }
 0x4be   : > { %v803_v9 = vsel %vm802_vm6, %v801_v7, %v797_v8 }
 0x4bf   : > { %v805_v10 = vrot.slane %v803_v9, 3 }
 0x4c1   : > { %v808_v11 = vsel %vm807_vm7, %v803_v9, %v805_v10 }
 0x4c2   : > { %1149 = vmatmul.mubr.f32.vlgmr.msra.gmra.mrb[0].mxu1 %v808_v11 }
 0x595   : > { %v898_v13 = vpop.f32.mrb[0].mxu1 }
 0x596   : > { %v899_v14 = vadd.f32 %v1070_v12, %v898_v13  ;;  %v1150_v15 = vpop.f32.mrb[1].mxu1 }
 0x598   : > { %902 = vst [vmem:[%s366_s11] sm:$0x3] %v899_v14 }
 0x599   : > { %1471 = shalt.err (!%p1468_p2)
}
 0x59a   : > { %s1472_s26 = scalar_lea.hbm %s1971_s9, 32  ;;  %s1476_s19 = scalar_lea.hbm %s2021_s6, 64 }
 0x59b   : > { %p1473_p5 = scmp.ne.s32.totalorder %s1971_s9, %s1472_s26  ;;  %p1477_p0 = scmp.lt.u32.totalorder %s1971_s9, %s2021_s6 }
 0x59c   : > { %p1478_p7 = scmp.lt.u32.totalorder %s1476_s19, %s1472_s26  ;;  %p1480_p6 = scmp.lt.u32.totalorder %s1472_s26, %s1971_s9 }
 0x59d   : > { %p1474_p12 = pnand %p1473_p5, %p2065_p10 }
 0x59e   : > { %p1479_p1 = por %p1478_p7, %p1477_p0 }
 0x59f   : > { %p1475_p3 = pneg %p1474_p12 }
 0x5a0   : > { %p1481_p8 = por %p1480_p6, %p1479_p1 }
 0x5a2   : > { %p1482_p9 = pnand %p1481_p8, %p1475_p3 }
 0x5a4   : > { %1485 = shalt.err (!%p1482_p9)
}
 0x5a5   : > { %1195 = dma.vmem_to_hbm [thread:$0]  (%p2065_p10), %s1973_s29, 32, %s1971_s9, %s904_s27  }
 0x5a6 PF: > { %s929_s20 = sand.u32 1, %s1520_s21   ;;  %p2066_p11 = scmp.ne.s32.totalorder %s2041_s28, 0 }
 0x5a7   : > { %p2067_p4 = scmp.ge.s32.totalorder %s1532_s24, 2  ;;  %s930_s12 = scalar_lea.sflag [#allocation4], %s929_s20 }
 0x5a9   : > { %p1215_p13 = pnand %p2067_p4, %p2066_p11 }
 0x5ab   : > { %1515 = dma.done.wait (!%p1215_p13), %s930_s12, 32  }
 0x5ac   : > { %1517 = vsyncadd (!%p1215_p13), %s930_s12, 4294967264  ;;  %s2068_s24 = sld [smem:[#allocation16_spill]]  ;;  %s2069_s1 = sld [smem:[#allocation17_spill]] }
 0x5ad   : > { %s2070_s21 = smov %s1524_s22  ;;  %s2071_s22 = smov %s1528_s23 }
 0x5b2   : > { %p23_p2 = scmp.ge.s32.totalorder %s2068_s24, 4   ;;  %s2072_s23 = smov %s2069_s1 }
 0x5b4   :  { %25 = sbr.rel (!%p23_p2) target bundleno = 11 (0xb), region = 121 }
 0x5bb   :  { %935 = vsyncpa [#allocation3], 1 }
 0x5bc   :  { %937 = vsyncpa [#allocation3 + $0x1], 1 }
 0x5bd   :  { %938 = vsyncpa [#allocation6], 1 }
 0x5be   :  { %940 = vsyncpa [#allocation6 + $0x1], 1 }
 0x5bf   :  { %941 = vsyncpa [#allocation9], 1 }
 0x5c0   :  { %942 = vsyncpa [#allocation4], 1 }
 0x5c1   :  { %944 = vsyncpa [#allocation4 + $0x1], 1 }

</bundles_post_ra>
